<compile_context>
chip_gen: v6e
topology: v6e:2x2x1
jax: 0.10.0
libtpu: 0.0.40
codegen_flags: <defaults>
</compile_context>

<pallas_src>
import jax
import jax.numpy as jnp
from jax.experimental import pallas as pl
from jax.experimental.pallas import tpu as pltpu


def _conv1x1_bias_kernel(x_ref, w_ref, b_ref, o_ref):
    # x_ref: (Cin, M)   w_ref: (Cout, Cin)   b_ref: (Cout, 1)   o_ref: (Cout, M)
    # M = Hout*Wout sits on the lane axis -> lane-dense loads/stores.
    # Contraction K = Cin is tiny but the MXU slot is otherwise idle, so the
    # systolic dot is effectively free; the kernel is DMA/launch bound.
    acc = jnp.dot(w_ref[...], x_ref[...], preferred_element_type=jnp.float32)
    o_ref[...] = (acc + b_ref[...]).astype(o_ref.dtype)


def conv1x1_pad1(x_nchw, weight, bias):
    """PyTorch Conv2d(Cin, Cout, kernel_size=1, stride=1, padding=1).

    x_nchw : (N, Cin, H, W) float32
    weight : (Cout, Cin, 1, 1) float32
    bias   : (Cout,) float32
    returns: (N, Cout, H+2, W+2) float32
    """
    N, Cin, H, W = x_nchw.shape
    Cout = weight.shape[0]
    Hout, Wout = H + 2, W + 2
    M = Hout * Wout

    # Zero-pad the input spatially (single small fused XLA op).  A 1x1 conv on
    # the zero-padded input is exactly Conv2d(..., padding=1): border pixels
    # become W @ 0 + b = bias, interior is the plain 1x1 conv.
    x_pad = jnp.pad(x_nchw, ((0, 0), (0, 0), (1, 1), (1, 1)))

    w2d = weight.reshape(Cout, Cin)   # (Cout, Cin)
    b2d = bias.reshape(Cout, 1)       # broadcast along lanes inside the kernel

    cost = pl.CostEstimate(
        flops=2 * N * Cout * Cin * M,
        transcendentals=0,
        bytes_accessed=4 * (N * Cin * M + N * Cout * M + Cout * Cin + Cout),
    )

    if N == 1:
        # NCHW -> (Cin, M) is a contiguous reshape (bitcast), no transpose.
        x_flat = x_pad.reshape(Cin, M)
        out_flat = pl.pallas_call(
            _conv1x1_bias_kernel,
            out_shape=jax.ShapeDtypeStruct((Cout, M), jnp.float32),
            in_specs=[
                pl.BlockSpec(memory_space=pltpu.MemorySpace.VMEM),
                pl.BlockSpec(memory_space=pltpu.MemorySpace.VMEM),
                pl.BlockSpec(memory_space=pltpu.MemorySpace.VMEM),
            ],
            out_specs=pl.BlockSpec(memory_space=pltpu.MemorySpace.VMEM),
            cost_estimate=cost,
        )(x_flat, w2d, b2d)
        # (Cout, M) -> (1, Cout, Hout, Wout) is a contiguous reshape (bitcast).
        return out_flat.reshape(1, Cout, Hout, Wout)

    # N > 1: batch grid axis with a squeezed block -> no NCHW transpose pass.
    x_flat = x_pad.reshape(N, Cin, M)
    out_flat = pl.pallas_call(
        _conv1x1_bias_kernel,
        out_shape=jax.ShapeDtypeStruct((N, Cout, M), jnp.float32),
        grid=(N,),
        in_specs=[
            pl.BlockSpec((None, Cin, M), lambda n: (n, 0, 0)),
            pl.BlockSpec((Cout, Cin), lambda n: (0, 0)),
            pl.BlockSpec((Cout, 1), lambda n: (0, 0)),
        ],
        out_specs=pl.BlockSpec((None, Cout, M), lambda n: (n, 0, 0)),
        compiler_params=pltpu.CompilerParams(dimension_semantics=("parallel",)),
        cost_estimate=cost,
    )(x_flat, w2d, b2d)
    return out_flat.reshape(N, Cout, Hout, Wout)


def model_forward(x1, weight, bias, other=None, padding=None):
    v1 = conv1x1_pad1(x1, weight, bias)
    # The original forward draws random `other`/`padding` tensors that are
    # never used, then returns an undefined `v2`.  We return v1.
    return v1


if __name__ == "__main__":
    key = jax.random.PRNGKey(0)
    k_x, k_w, k_b = jax.random.split(key, 3)

    # Same shape as the reference script's input: (1, 6, 48, 64).
    x1 = jax.random.normal(k_x, (1, 6, 48, 64), dtype=jnp.float32)

    # Deterministic parameters (Conv2d(6, 8, 1): weight (8,6,1,1), bias (8,))
    weight = jax.random.normal(k_w, (8, 6, 1, 1), dtype=jnp.float32) * 0.1
    bias = jax.random.normal(k_b, (8,), dtype=jnp.float32) * 0.1

    out = model_forward(x1, weight, bias)
    out = jax.block_until_ready(out)

    # Sanity checks against a plain-JAX reference.
    assert out.shape == (1, 8, 50, 66), out.shape
    x_pad_ref = jnp.pad(x1, ((0, 0), (0, 0), (1, 1), (1, 1)))
    ref = jnp.einsum("nchw,oc->nohw", x_pad_ref, weight.reshape(8, 6)) \
        + bias.reshape(1, 8, 1, 1)
    assert jnp.allclose(out, ref, atol=1e-5, rtol=1e-5)

    print("KERNEL_OK")
</pallas_src>

<mosaic_0001>
module attributes {stable_mosaic.version = 11 : i64} {
  func.func @_conv1x1_bias_kernel(%arg0: memref<6x3300xf32, #tpu.memory_space<vmem>>, %arg1: memref<8x6xf32, #tpu.memory_space<vmem>>, %arg2: memref<8x1xf32, #tpu.memory_space<vmem>>, %arg3: memref<8x3300xf32, #tpu.memory_space<vmem>>) attributes {dimension_semantics = [], scalar_prefetch = 0 : i64, scratch_operands = 0 : i64, tpu.core_type = #tpu.core_type<tc>} {
    %c0 = arith.constant 0 : index
    %c0_0 = arith.constant 0 : index
    %0 = vector.load %arg1[%c0, %c0_0] : memref<8x6xf32, #tpu.memory_space<vmem>>, vector<8x6xf32>
    %c0_1 = arith.constant 0 : index
    %c0_2 = arith.constant 0 : index
    %1 = vector.load %arg0[%c0_1, %c0_2] : memref<6x3300xf32, #tpu.memory_space<vmem>>, vector<6x3300xf32>
    %cst = arith.constant dense<0.000000e+00> : vector<8x3300xf32>
    %2 = tpu.matmul %0, %1, %cst {dimension_numbers = #tpu.dot_dimension_numbers<[1], [0], [0], [1], [0, 0, 1, 1], [], []>} : vector<8x6xf32>, vector<6x3300xf32>, vector<8x3300xf32> -> vector<8x3300xf32>
    %c0_3 = arith.constant 0 : index
    %c0_4 = arith.constant 0 : index
    %3 = vector.load %arg2[%c0_3, %c0_4] : memref<8x1xf32, #tpu.memory_space<vmem>>, vector<8x1xf32>
    %4 = vector.broadcast %3 : vector<8x1xf32> to vector<8x3300xf32>
    %5 = arith.addf %2, %4 : vector<8x3300xf32>
    %c0_5 = arith.constant 0 : index
    %c0_6 = arith.constant 0 : index
    %6 = vector.load %arg3[%c0_5, %c0_6] : memref<8x3300xf32, #tpu.memory_space<vmem>>, vector<8x3300xf32>
    tpu.vector_store %arg3[%c0_5, %c0_6], %5 {strides = array<i32>} : memref<8x3300xf32, #tpu.memory_space<vmem>>, vector<8x3300xf32>,
    return
  }
}

</mosaic_0001>

<bundles_post_ra>
// kernel: tpu_custom_call.1
= control target key start
LH: loop header
LB: loop body
LE: loop exit
PB: predicated region body
PF: predicated region fallthrough
CT: control target
= control target key end

     0   :  { %8 = vsyncpa [#allocation3], 0  ;;  %s1327_s0 = inlined_call_operand.hbm [shape: f32[6,3300], index: 0, kind: input, shape index: {}]   ;;  %s1328_s1 = inlined_call_operand.vmem [shape: f32[8,6], index: 1, kind: input, shape index: {}]   ;;  %s1329_s2 = inlined_call_operand.vmem [shape: f32[8,1], index: 2, kind: input, shape index: {}]   ;;  %s1330_s3 = inlined_call_operand.hbm [shape: f32[8,3300], index: 3, kind: output, shape index: {}]  }
   0x1   :  { %9 = vsyncpa [#allocation4], 0  ;;  %s1196_s12 = smov [#allocation2]  }
   0x2   :  { %s16_s13 = sshll.u32 %s1196_s12, 4  ;;  %s17_s13 = int_to_ptr.vmem [resolvable:$true] %s16_s13 }
   0x3   :  { %s1160_s14 = scalar_lea.vmem %s17_s13, 3328  ;;  %p1165_p1 = scmp.lt.s32.totalorder %s17_s13, %s17_s13 }
   0x4   :  { %p1161_p0 = scmp.ne.s32.totalorder %s17_s13, %s1160_s14  ;;  %p1166_p2 = scmp.lt.s32.totalorder %s1160_s14, %s1160_s14 }
   0x6   :  { %p1167_p3 = por %p1166_p2, %p1165_p1 }
   0x8   :  { %p1168_p4 = pnand %p1167_p3, %p1161_p0 }
   0xa   :  { %1171 = shalt.err (!%p1168_p4)
}
   0xb   :  { %19 = dma.hbm_to_vmem [thread:$0]  %s1327_s0, 3328, %s17_s13, [#allocation3]  }
   0xc   :  { %1192 = dma.done.wait [#allocation3], 3328  }
   0xd   :  { %1193 = vsyncadd [#allocation3], 4294963968  ;;  %v1197_v0 = vmov 0.0   ;;  %v1198_v1 = vmov 0   ;;  %vm64_vm0 = vcmask 1045504   ;;  %v1228_v4 = vld [vmem:[%s1328_s1] sm:$0xff] }
   0xe   :  { %207 = vmatprep.mubr.f32.mxu0 %v1197_v0  ;;  %278 = vmatprep.mubr.f32.mxu1 %v1197_v0  ;;  %v29_v2 = vld [vmem:[#allocation2 + $0x8] sm:$0x3f]  ;;  %v28_v3 = vld [vmem:[#allocation2] sm:$0x3f]  ;;  %vm60_vm1 = vcmask 48128   ;;  %vm1091_vm2 = vcmask 818176  }
   0xf   :  { %1151 = vset.pattern.permute.xlu0 %v1198_v1  ;;  %1108 = vmatprep.subr.msk.mxu0 %vm64_vm0, %v29_v2  ;;  %v33_v5 = vld [vmem:[#allocation2 + $0x28] sm:$0x3f]  ;;  %v31_v6 = vld [vmem:[#allocation2 + $0x18] sm:$0x3f]  ;;  %v32_v7 = vld [vmem:[#allocation2 + $0x20] sm:$0x3f] }
  0x10   :  { %1109 = vmatpush1.msk.msra.mxu0 %vm64_vm0, %v28_v3  ;;  %1111 = vmatprep.subr.msk.mxu1 %vm64_vm0, %v31_v6  ;;  %v30_v8 = vld [vmem:[#allocation2 + $0x10] sm:$0x3f]  ;;  %v35_v9 = vld [vmem:[#allocation2 + $0x38] sm:$0x3f]  ;;  %v37_v10 = vld [vmem:[#allocation2 + $0x48] sm:$0x3f] }
  0x11   :  { %1110 = vmatmul.mubr.msk.f32.vlgmr.msra.gmra.mxu0 %vm60_vm1, %v1228_v4  ;;  %1114 = vmatprep.subr.msk.mxu0 %vm64_vm0, %v33_v5  ;;  %v34_v11 = vld [vmem:[#allocation2 + $0x30] sm:$0x3f]  ;;  %v36_v12 = vld [vmem:[#allocation2 + $0x40] sm:$0x3f]  ;;  %v39_v13 = vld [vmem:[#allocation2 + $0x58] sm:$0x3f] }
  0x12   :  { %1115 = vmatpush1.msk.msra.mxu0 %vm64_vm0, %v32_v7  ;;  %1112 = vmatpush1.msk.msra.mxu1 %vm64_vm0, %v30_v8  ;;  %v41_v14 = vld [vmem:[#allocation2 + $0x68] sm:$0x3f]  ;;  %v38_v15 = vld [vmem:[#allocation2 + $0x50] sm:$0x3f]  ;;  %v40_v16 = vld [vmem:[#allocation2 + $0x60] sm:$0x3f] }
  0x13   :  { %1113 = vmatmul.mubr.msk.f32.vlgmr.msra.gmra.mxu1 %vm60_vm1, %v1228_v4  ;;  %349 = vmatprep.mubr.f32.mxu0 %v1197_v0  ;;  %v43_v17 = vld [vmem:[#allocation2 + $0x78] sm:$0x3f]  ;;  %v45_v18 = vld [vmem:[#allocation2 + $0x88] sm:$0x3f]  ;;  %v42_v19 = vld [vmem:[#allocation2 + $0x70] sm:$0x3f] }
  0x14   :  { %1117 = vmatprep.subr.msk.mxu1 %vm64_vm0, %v35_v9  ;;  %1120 = vmatprep.subr.msk.mxu0 %vm64_vm0, %v37_v10  ;;  %v44_v20 = vld [vmem:[#allocation2 + $0x80] sm:$0x3f]  ;;  %v47_v21 = vld [vmem:[#allocation2 + $0x98] sm:$0x3f]  ;;  %v49_v22 = vld [vmem:[#allocation2 + $0xa8] sm:$0x3f] }
  0x15   :  { %1116 = vmatmul.mubr.msk.f32.vlgmr.msra.gmra.mxu0 %vm60_vm1, %v1228_v4  ;;  %1118 = vmatpush1.msk.msra.mxu1 %vm64_vm0, %v34_v11  ;;  %v46_v23 = vld [vmem:[#allocation2 + $0x90] sm:$0x3f]  ;;  %v48_v24 = vld [vmem:[#allocation2 + $0xa0] sm:$0x3f]  ;;  %v51_v25 = vld [vmem:[#allocation2 + $0xb8] sm:$0x3f] }
  0x16   :  { %1121 = vmatpush1.msk.msra.mxu0 %vm64_vm0, %v36_v12  ;;  %420 = vmatprep.mubr.f32.mxu1 %v1197_v0  ;;  %v53_v26 = vld [vmem:[#allocation2 + $0xc8] sm:$0x3f]  ;;  %v50_v27 = vld [vmem:[#allocation2 + $0xb0] sm:$0x3f]  ;;  %v52_v28 = vld [vmem:[#allocation2 + $0xc0] sm:$0x3f] }
  0x17   :  { %1119 = vmatmul.mubr.msk.f32.vlgmr.msra.gmra.mxu1 %vm60_vm1, %v1228_v4  ;;  %491 = vmatprep.mubr.f32.mxu0 %v1197_v0  ;;  %v54_v29 = vld [vmem:[%s1329_s2] sm:$0xff]  ;;  %s1199_s2 = smov [#allocation5]  }
  0x18   :  { %1123 = vmatprep.subr.msk.mxu1 %vm64_vm0, %v39_v13  ;;  %1126 = vmatprep.subr.msk.mxu0 %vm64_vm0, %v41_v14  ;;  %s1099_s19 = sshll.u32 %s1199_s2, 4  ;;  %s1100_s19 = int_to_ptr.vmem [resolvable:$true] %s1099_s19 }
  0x19   :  { %1122 = vmatmul.mubr.msk.f32.vlgmr.msra.gmra.mxu0 %vm60_vm1, %v1228_v4  ;;  %1124 = vmatpush1.msk.msra.mxu1 %vm64_vm0, %v38_v15  ;;  %s1172_s20 = scalar_lea.vmem %s1100_s19, 3328  ;;  %p1177_p6 = scmp.lt.s32.totalorder %s1100_s19, %s1100_s19 }
  0x1a   :  { %1127 = vmatpush1.msk.msra.mxu0 %vm64_vm0, %v40_v16  ;;  %562 = vmatprep.mubr.f32.mxu1 %v1197_v0  ;;  %p1173_p5 = scmp.ne.s32.totalorder %s1100_s19, %s1172_s20  ;;  %p1178_p7 = scmp.lt.s32.totalorder %s1172_s20, %s1172_s20 }
  0x1b   :  { %1125 = vmatmul.mubr.msk.f32.vlgmr.msra.gmra.mxu1 %vm60_vm1, %v1228_v4  ;;  %633 = vmatprep.mubr.f32.mxu0 %v1197_v0 }
  0x1c   :  { %1129 = vmatprep.subr.msk.mxu1 %vm64_vm0, %v43_v17  ;;  %1132 = vmatprep.subr.msk.mxu0 %vm64_vm0, %v45_v18  ;;  %p1179_p8 = por %p1178_p7, %p1177_p6 }
  0x1d   :  { %1128 = vmatmul.mubr.msk.f32.vlgmr.msra.gmra.mxu0 %vm60_vm1, %v1228_v4  ;;  %1130 = vmatpush1.msk.msra.mxu1 %vm64_vm0, %v42_v19 }
  0x1e   :  { %1133 = vmatpush1.msk.msra.mxu0 %vm64_vm0, %v44_v20  ;;  %704 = vmatprep.mubr.f32.mxu1 %v1197_v0  ;;  %p1180_p9 = pnand %p1179_p8, %p1173_p5 }
  0x1f   :  { %1131 = vmatmul.mubr.msk.f32.vlgmr.msra.gmra.mxu1 %vm60_vm1, %v1228_v4  ;;  %775 = vmatprep.mubr.f32.mxu0 %v1197_v0 }
  0x20   :  { %1135 = vmatprep.subr.msk.mxu1 %vm64_vm0, %v47_v21  ;;  %1138 = vmatprep.subr.msk.mxu0 %vm64_vm0, %v49_v22 }
  0x21   :  { %1134 = vmatmul.mubr.msk.f32.vlgmr.msra.gmra.mxu0 %vm60_vm1, %v1228_v4  ;;  %1136 = vmatpush1.msk.msra.mxu1 %vm64_vm0, %v46_v23 }
  0x22   :  { %1139 = vmatpush1.msk.msra.mxu0 %vm64_vm0, %v48_v24  ;;  %846 = vmatprep.mubr.f32.mxu1 %v1197_v0 }
  0x23   :  { %1137 = vmatmul.mubr.msk.f32.vlgmr.msra.gmra.mxu1 %vm60_vm1, %v1228_v4  ;;  %917 = vmatprep.mubr.f32.mxu0 %v1197_v0 }
  0x24   :  { %1141 = vmatprep.subr.msk.mxu1 %vm64_vm0, %v51_v25  ;;  %1144 = vmatprep.subr.msk.mxu0 %vm64_vm0, %v53_v26 }
  0x25   :  { %1140 = vmatmul.mubr.msk.f32.vlgmr.msra.gmra.mxu0 %vm60_vm1, %v1228_v4  ;;  %1142 = vmatpush1.msk.msra.mxu1 %vm64_vm0, %v50_v27 }
  0x26   :  { %1145 = vmatpush1.msk.msra.mxu0 %vm64_vm0, %v52_v28  ;;  %988 = vmatprep.mubr.f32.mxu1 %v1197_v0 }
  0x27   :  { %1143 = vmatmul.mubr.msk.f32.vlgmr.msra.gmra.mxu1 %vm60_vm1, %v1228_v4  ;;  %1059 = vmatprep.mubr.f32.mxu0 %v1197_v0 }
  0x28   :  { %57 = vperm.xlu0 %1151, %v54_v29  }
  0x29   :  { %1146 = vmatmul.mubr.msk.f32.vlgmr.msra.gmra.mxu0 %vm60_vm1, %v1228_v4 }
  0xa3   :  { %v1296_v30 = vpop.permute.xlu0 %57 }
  0xd1   :  { %v209_v31 = vpop.f32.mrf.mxu0 }
  0xd2   :  { %v210_v32 = vadd.f32 %v209_v31, %v1296_v30 }
  0xd3   :  { %v211_v33 = vpop.f32.mrf.mxu0  ;;  %v280_v34 = vpop.f32.mrf.mxu1 }
  0xd4   :  { %1066 = vst [vmem:[#allocation5] sm:$0xff] %v210_v32  ;;  %v212_v35 = vadd.f32 %v211_v33, %v1296_v30  ;;  %v281_v36 = vadd.f32 %v280_v34, %v1296_v30 }
  0xd5   :  { %v351_v37 = vpop.f32.mrf.mxu0  ;;  %v282_v38 = vpop.f32.mrf.mxu1 }
  0xd6   :  { %1067 = vst [vmem:[#allocation5 + $0x8] sm:$0xff] %v212_v35  ;;  %1068 = vst [vmem:[#allocation5 + $0x10] sm:$0xff] %v281_v36  ;;  %v352_v39 = vadd.f32 %v351_v37, %v1296_v30  ;;  %v283_v40 = vadd.f32 %v282_v38, %v1296_v30 }
  0xd7   :  { %v353_v41 = vpop.f32.mrf.mxu0  ;;  %v422_v42 = vpop.f32.mrf.mxu1 }
  0xd8   :  { %1070 = vst [vmem:[#allocation5 + $0x20] sm:$0xff] %v352_v39  ;;  %1069 = vst [vmem:[#allocation5 + $0x18] sm:$0xff] %v283_v40  ;;  %v354_v43 = vadd.f32 %v353_v41, %v1296_v30  ;;  %v423_v44 = vadd.f32 %v422_v42, %v1296_v30 }
  0xd9   :  { %v493_v45 = vpop.f32.mrf.mxu0  ;;  %v424_v46 = vpop.f32.mrf.mxu1 }
  0xda   :  { %1071 = vst [vmem:[#allocation5 + $0x28] sm:$0xff] %v354_v43  ;;  %1072 = vst [vmem:[#allocation5 + $0x30] sm:$0xff] %v423_v44  ;;  %v494_v47 = vadd.f32 %v493_v45, %v1296_v30  ;;  %v425_v48 = vadd.f32 %v424_v46, %v1296_v30 }
  0xdb   :  { %v495_v49 = vpop.f32.mrf.mxu0  ;;  %v564_v50 = vpop.f32.mrf.mxu1 }
  0xdc   :  { %1074 = vst [vmem:[#allocation5 + $0x40] sm:$0xff] %v494_v47  ;;  %1073 = vst [vmem:[#allocation5 + $0x38] sm:$0xff] %v425_v48  ;;  %v496_v51 = vadd.f32 %v495_v49, %v1296_v30  ;;  %v565_v52 = vadd.f32 %v564_v50, %v1296_v30 }
  0xdd   :  { %v635_v53 = vpop.f32.mrf.mxu0  ;;  %v566_v54 = vpop.f32.mrf.mxu1 }
  0xde   :  { %1075 = vst [vmem:[#allocation5 + $0x48] sm:$0xff] %v496_v51  ;;  %1076 = vst [vmem:[#allocation5 + $0x50] sm:$0xff] %v565_v52  ;;  %v636_v55 = vadd.f32 %v635_v53, %v1296_v30  ;;  %v567_v56 = vadd.f32 %v566_v54, %v1296_v30 }
  0xdf   :  { %v637_v57 = vpop.f32.mrf.mxu0  ;;  %v706_v58 = vpop.f32.mrf.mxu1 }
  0xe0   :  { %1078 = vst [vmem:[#allocation5 + $0x60] sm:$0xff] %v636_v55  ;;  %1077 = vst [vmem:[#allocation5 + $0x58] sm:$0xff] %v567_v56  ;;  %v638_v59 = vadd.f32 %v637_v57, %v1296_v30  ;;  %v707_v60 = vadd.f32 %v706_v58, %v1296_v30 }
  0xe1   :  { %v777_v61 = vpop.f32.mrf.mxu0  ;;  %v708_v62 = vpop.f32.mrf.mxu1 }
  0xe2   :  { %1079 = vst [vmem:[#allocation5 + $0x68] sm:$0xff] %v638_v59  ;;  %1080 = vst [vmem:[#allocation5 + $0x70] sm:$0xff] %v707_v60  ;;  %v778_v63 = vadd.f32 %v777_v61, %v1296_v30  ;;  %v709_v0 = vadd.f32 %v708_v62, %v1296_v30 }
  0xe3   :  { %v779_v1 = vpop.f32.mrf.mxu0  ;;  %v848_v2 = vpop.f32.mrf.mxu1 }
  0xe4   :  { %1082 = vst [vmem:[#allocation5 + $0x80] sm:$0xff] %v778_v63  ;;  %1081 = vst [vmem:[#allocation5 + $0x78] sm:$0xff] %v709_v0  ;;  %v780_v3 = vadd.f32 %v779_v1, %v1296_v30  ;;  %v849_v4 = vadd.f32 %v848_v2, %v1296_v30 }
  0xe5   :  { %v919_v5 = vpop.f32.mrf.mxu0  ;;  %v850_v6 = vpop.f32.mrf.mxu1 }
  0xe6   :  { %1083 = vst [vmem:[#allocation5 + $0x88] sm:$0xff] %v780_v3  ;;  %1084 = vst [vmem:[#allocation5 + $0x90] sm:$0xff] %v849_v4  ;;  %v920_v7 = vadd.f32 %v919_v5, %v1296_v30  ;;  %v851_v8 = vadd.f32 %v850_v6, %v1296_v30 }
  0xe7   :  { %v921_v9 = vpop.f32.mrf.mxu0  ;;  %v990_v10 = vpop.f32.mrf.mxu1 }
  0xe8   :  { %1086 = vst [vmem:[#allocation5 + $0xa0] sm:$0xff] %v920_v7  ;;  %1085 = vst [vmem:[#allocation5 + $0x98] sm:$0xff] %v851_v8  ;;  %v922_v11 = vadd.f32 %v921_v9, %v1296_v30  ;;  %v991_v12 = vadd.f32 %v990_v10, %v1296_v30 }
  0xe9   :  { %v1061_v13 = vpop.f32.mrf.mxu0  ;;  %v992_v14 = vpop.f32.mrf.mxu1 }
  0xea   :  { %1087 = vst [vmem:[#allocation5 + $0xa8] sm:$0xff] %v922_v11  ;;  %1088 = vst [vmem:[#allocation5 + $0xb0] sm:$0xff] %v991_v12  ;;  %v1062_v15 = vadd.f32 %v1061_v13, %v1296_v30  ;;  %v993_v16 = vadd.f32 %v992_v14, %v1296_v30 }
  0xeb   :  { %v1063_v17 = vpop.f32.mrf.mxu0 }
  0xec   :  { %1090 = vst [vmem:[#allocation5 + $0xc0] sm:$0xff] %v1062_v15  ;;  %1089 = vst [vmem:[#allocation5 + $0xb8] sm:$0xff] %v993_v16  ;;  %v1064_v18 = vadd.f32 %v1063_v17, %v1296_v30 }
  0xee   :  { %1092 = vst.msk [vmem:[#allocation5 + $0xc8] sm:$0xff] %vm1091_vm2, %v1064_v18 }
  0xef   :  { %1183 = shalt.err (!%p1180_p9)
}
  0xf0   :  { %1102 = dma.vmem_to_hbm [thread:$0]  %s1100_s19, 3328, %s1330_s3, [#allocation4]  }
  0xf1   :  { %1194 = dma.done.wait [#allocation4], 3328  }
  0xf2   :  { %1195 = vsyncadd [#allocation4], 4294963968 }
  0xf3   :  { %1106 = vsyncpa [#allocation3], 1 }
  0xf4   :  { %1107 = vsyncpa [#allocation4], 1 }

</bundles_post_ra>
